<compile_context>
chip_gen: v7x
topology: tpu7x:2x2x1
jax: 0.10.0
libtpu: 0.0.40
codegen_flags: <defaults>
</compile_context>

<pallas_src>
import functools

import jax
import jax.numpy as jnp
from jax import lax
from jax.experimental import pallas as pl
from jax.experimental.pallas import tpu as pltpu

EPS = 1e-8  # matches torch F.cosine_similarity default eps


def _triplet_cos_kernel(x_ref, w1_ref, b1_ref, w2_ref, b2_ref, y_ref, z_ref,
                        emb_ref, dist_ref, *, matmul_dtype):
    """One batch tile: MLP embedding + cosine similarities against y and z."""
    # --- embedding net: Linear -> ReLU -> Linear ---------------------------
    # MXU operands cast to `matmul_dtype` (bf16 by default) *inside* the
    # kernel (no wrapper-side cast pass over HBM); f32 accumulation; all
    # elementwise / reduction math stays f32.
    x = x_ref[...].astype(matmul_dtype)
    w1 = w1_ref[...].astype(matmul_dtype)
    w2 = w2_ref[...].astype(matmul_dtype)

    h = jnp.dot(x, w1, preferred_element_type=jnp.float32)
    h = jnp.maximum(h + b1_ref[...].astype(jnp.float32), 0.0)
    e = (jnp.dot(h.astype(matmul_dtype), w2, preferred_element_type=jnp.float32)
         + b2_ref[...].astype(jnp.float32))
    emb_ref[...] = e.astype(emb_ref.dtype)

    y = y_ref[...].astype(jnp.float32)
    z = z_ref[...].astype(jnp.float32)

    # --- cosine similarity along the feature axis (torch dim=1) ------------
    # torch:  dot / max(||a|| * ||b||, eps)
    #      == dot * rsqrt(max(saa * sbb, eps^2))
    sxx = jnp.sum(e * e, axis=-1, keepdims=True)
    syy = jnp.sum(y * y, axis=-1, keepdims=True)
    szz = jnp.sum(z * z, axis=-1, keepdims=True)
    sxy = jnp.sum(e * y, axis=-1, keepdims=True)
    sxz = jnp.sum(e * z, axis=-1, keepdims=True)

    da = sxy * lax.rsqrt(jnp.maximum(sxx * syy, EPS * EPS))
    db = sxz * lax.rsqrt(jnp.maximum(sxx * szz, EPS * EPS))

    # Single write of the packed (TB, 2) tile: [:, 0] = dist_a, [:, 1] = dist_b.
    dist_ref[...] = jnp.concatenate([da, db], axis=-1)


def _round_up(n, m):
    return ((n + m - 1) // m) * m


def triplet_network_cos(x, y, z, params, *, tb=4096,
                        matmul_dtype=jnp.bfloat16):
    """Returns (dist_a, dist_b, embedded_x, y, z) — same tuple as the torch module.

    Pass matmul_dtype=jnp.float32 for strict all-f32 parity with torch.
    """
    w1, b1, w2, b2 = params
    B, IN = x.shape
    H = w1.shape[1]
    D = w2.shape[1]

    b1_2d = jnp.reshape(b1, (1, H))
    b2_2d = jnp.reshape(b2, (1, D))

    # Tile selection (no wrapper padding — ragged last block via cdiv grid):
    #   * B <= 8: single full block (no sublane constraint; block == full dim).
    #   * else:  multiple-of-8 tile, capped at `tb`, and split so there are
    #            at least 2 grid steps (keeps both v7x TensorCores busy).
    if B <= 8:
        tb_eff = B
    else:
        tb_eff = min(tb, _round_up(pl.cdiv(B, 2), 8))
    grid = (pl.cdiv(B, tb_eff),)

    def batch_spec(cols):
        return pl.BlockSpec((tb_eff, cols), lambda i: (i, 0))

    def fixed_spec(shape):
        return pl.BlockSpec(shape, lambda i: (0, 0))

    kernel = functools.partial(_triplet_cos_kernel, matmul_dtype=matmul_dtype)

    emb, dist = pl.pallas_call(
        kernel,
        out_shape=(
            jax.ShapeDtypeStruct((B, D), jnp.float32),  # embedded_x
            jax.ShapeDtypeStruct((B, 2), jnp.float32),  # [dist_a | dist_b]
        ),
        grid=grid,
        in_specs=[
            batch_spec(IN),        # x (native dtype; cast to bf16 in-kernel)
            fixed_spec((IN, H)),   # w1
            fixed_spec((1, H)),    # b1
            fixed_spec((H, D)),    # w2
            fixed_spec((1, D)),    # b2
            batch_spec(D),         # y (native dtype)
            batch_spec(D),         # z (native dtype)
        ],
        out_specs=(
            batch_spec(D),         # embedded_x
            batch_spec(2),         # packed distances
        ),
        compiler_params=pltpu.CompilerParams(
            # Batch tiles are independent -> shard grid steps across TCs (v7x).
            dimension_semantics=("parallel",),
            vmem_limit_bytes=32 * 1024 * 1024,
        ),
    )(x, w1, b1_2d, w2, b2_2d, y, z)

    dist_a = dist[:, 0]
    dist_b = dist[:, 1]
    # torch returns (dist_a, dist_b, embedded_x, y, z); y/z pass through untouched.
    return dist_a, dist_b, emb, y, z


def init_params(key, in_dim, hidden, out_dim):
    k1, k2, k3, k4 = jax.random.split(key, 4)
    w1 = jax.random.normal(k1, (in_dim, hidden), jnp.float32) * 0.1
    b1 = jax.random.normal(k2, (1, hidden), jnp.float32) * 0.1
    w2 = jax.random.normal(k3, (hidden, out_dim), jnp.float32) * 0.1
    b2 = jax.random.normal(k4, (1, out_dim), jnp.float32) * 0.1
    return (w1, b1, w2, b2)


def _reference(x, y, z, params, matmul_dtype=jnp.bfloat16):
    """Pure-JAX reference (same bf16 matmul casting, f32 reductions)."""
    w1, b1, w2, b2 = params
    xm = x.astype(matmul_dtype)
    w1m = w1.astype(matmul_dtype)
    w2m = w2.astype(matmul_dtype)
    h = jnp.maximum(
        jnp.dot(xm, w1m, preferred_element_type=jnp.float32) + b1.reshape(1, -1),
        0.0)
    e = jnp.dot(h.astype(matmul_dtype), w2m,
                preferred_element_type=jnp.float32) + b2.reshape(1, -1)

    def cos(a, b):
        num = jnp.sum(a * b, axis=-1)
        den = jnp.sqrt(jnp.sum(a * a, axis=-1) * jnp.sum(b * b, axis=-1))
        return num / jnp.maximum(den, EPS)

    return cos(e, y), cos(e, z), e, y, z


if __name__ == "__main__":
    IN, H, D = 32, 64, 32

    key = jax.random.PRNGKey(0)
    kp, kdata = jax.random.split(key)
    params = init_params(kp, IN, H, D)

    fwd = jax.jit(functools.partial(triplet_network_cos))

    ok = True
    # B=8   -> single full block path (grid of 1).
    # B=200 -> 2 grid steps of 104 rows (ragged last tile: 96 valid + 8 OOB,
    #          exercises the no-pad / cdiv path and both-TC sharding on v7x).
    for B in (8, 200):
        kx, ky, kz, kdata = jax.random.split(kdata, 4)
        x = jax.random.normal(kx, (B, IN), jnp.float32)
        y = jax.random.normal(ky, (B, D), jnp.float32)
        z = jax.random.normal(kz, (B, D), jnp.float32)

        out = jax.block_until_ready(fwd(x, y, z, params))
        ref = _reference(x, y, z, params)
        for o, r in zip(out, ref):
            ok = ok and bool(jnp.allclose(o, r, atol=1e-3, rtol=1e-3))

    assert ok, "Pallas kernel output mismatch vs reference"
    print("KERNEL_OK")
</pallas_src>

<mosaic_0001>
module attributes {stable_mosaic.version = 11 : i64} {
  func.func @_triplet_cos_kernel(%arg0: i32, %arg1: memref<8x32xf32, #tpu.memory_space<vmem>>, %arg2: memref<32x64xf32, #tpu.memory_space<vmem>>, %arg3: memref<1x64xf32, #tpu.memory_space<vmem>>, %arg4: memref<64x32xf32, #tpu.memory_space<vmem>>, %arg5: memref<1x32xf32, #tpu.memory_space<vmem>>, %arg6: memref<8x32xf32, #tpu.memory_space<vmem>>, %arg7: memref<8x32xf32, #tpu.memory_space<vmem>>, %arg8: memref<8x32xf32, #tpu.memory_space<vmem>>, %arg9: memref<8x2xf32, #tpu.memory_space<vmem>>) attributes {dimension_semantics = [#tpu.dimension_semantics<parallel>], iteration_bounds = array<i64: 1>, scalar_prefetch = 0 : i64, scratch_operands = 0 : i64, tpu.core_type = #tpu.core_type<tc>, window_params = [{transform_indices = @transform_0, window_bounds = array<i64: 8, 32>}, {pipeline_mode = #tpu.pipeline_mode<synchronous>, transform_indices = @transform_1, window_bounds = array<i64: 32, 64>}, {pipeline_mode = #tpu.pipeline_mode<synchronous>, transform_indices = @transform_2, window_bounds = array<i64: 1, 64>}, {pipeline_mode = #tpu.pipeline_mode<synchronous>, transform_indices = @transform_3, window_bounds = array<i64: 64, 32>}, {pipeline_mode = #tpu.pipeline_mode<synchronous>, transform_indices = @transform_4, window_bounds = array<i64: 1, 32>}, {transform_indices = @transform_5, window_bounds = array<i64: 8, 32>}, {transform_indices = @transform_6, window_bounds = array<i64: 8, 32>}, {transform_indices = @transform_7, window_bounds = array<i64: 8, 32>}, {transform_indices = @transform_8, window_bounds = array<i64: 8, 2>}]} {
    %c0 = arith.constant 0 : index
    %c0_0 = arith.constant 0 : index
    %0 = vector.load %arg1[%c0, %c0_0] : memref<8x32xf32, #tpu.memory_space<vmem>>, vector<8x32xf32>
    %1 = arith.truncf %0 : vector<8x32xf32> to vector<8x32xbf16>
    %c0_1 = arith.constant 0 : index
    %c0_2 = arith.constant 0 : index
    %2 = vector.load %arg2[%c0_1, %c0_2] : memref<32x64xf32, #tpu.memory_space<vmem>>, vector<32x64xf32>
    %3 = arith.truncf %2 : vector<32x64xf32> to vector<32x64xbf16>
    %c0_3 = arith.constant 0 : index
    %c0_4 = arith.constant 0 : index
    %4 = vector.load %arg4[%c0_3, %c0_4] : memref<64x32xf32, #tpu.memory_space<vmem>>, vector<64x32xf32>
    %5 = arith.truncf %4 : vector<64x32xf32> to vector<64x32xbf16>
    %cst = arith.constant dense<0.000000e+00> : vector<8x64xf32>
    %6 = tpu.matmul %1, %3, %cst {dimension_numbers = #tpu.dot_dimension_numbers<[1], [0], [0], [1], [0, 0, 1, 1], [], []>} : vector<8x32xbf16>, vector<32x64xbf16>, vector<8x64xf32> -> vector<8x64xf32>
    %c0_5 = arith.constant 0 : index
    %c0_6 = arith.constant 0 : index
    %7 = vector.load %arg3[%c0_5, %c0_6] : memref<1x64xf32, #tpu.memory_space<vmem>>, vector<1x64xf32>
    %8 = vector.broadcast %7 : vector<1x64xf32> to vector<8x64xf32>
    %9 = arith.addf %6, %8 : vector<8x64xf32>
    %cst_7 = arith.constant 0.000000e+00 : f32
    %10 = vector.broadcast %cst_7 : f32 to vector<8x64xf32>
    %11 = arith.maximumf %9, %10 : vector<8x64xf32>
    %12 = arith.truncf %11 : vector<8x64xf32> to vector<8x64xbf16>
    %cst_8 = arith.constant dense<0.000000e+00> : vector<8x32xf32>
    %13 = tpu.matmul %12, %5, %cst_8 {dimension_numbers = #tpu.dot_dimension_numbers<[1], [0], [0], [1], [0, 0, 1, 1], [], []>} : vector<8x64xbf16>, vector<64x32xbf16>, vector<8x32xf32> -> vector<8x32xf32>
    %c0_9 = arith.constant 0 : index
    %c0_10 = arith.constant 0 : index
    %14 = vector.load %arg5[%c0_9, %c0_10] : memref<1x32xf32, #tpu.memory_space<vmem>>, vector<1x32xf32>
    %15 = vector.broadcast %14 : vector<1x32xf32> to vector<8x32xf32>
    %16 = arith.addf %13, %15 : vector<8x32xf32>
    %c0_11 = arith.constant 0 : index
    %c0_12 = arith.constant 0 : index
    %17 = vector.load %arg8[%c0_11, %c0_12] : memref<8x32xf32, #tpu.memory_space<vmem>>, vector<8x32xf32>
    tpu.vector_store %arg8[%c0_11, %c0_12], %16 {strides = array<i32>} : memref<8x32xf32, #tpu.memory_space<vmem>>, vector<8x32xf32>,
    %c0_13 = arith.constant 0 : index
    %c0_14 = arith.constant 0 : index
    %18 = vector.load %arg6[%c0_13, %c0_14] : memref<8x32xf32, #tpu.memory_space<vmem>>, vector<8x32xf32>
    %c0_15 = arith.constant 0 : index
    %c0_16 = arith.constant 0 : index
    %19 = vector.load %arg7[%c0_15, %c0_16] : memref<8x32xf32, #tpu.memory_space<vmem>>, vector<8x32xf32>
    %20 = arith.mulf %16, %16 : vector<8x32xf32>
    %cst_17 = arith.constant dense<0.000000e+00> : vector<8xf32>
    %21 = vector.multi_reduction <add>, %20, %cst_17 [1] : vector<8x32xf32> to vector<8xf32>
    %22 = vector.shape_cast %21 : vector<8xf32> to vector<8x1xf32>
    %23 = arith.mulf %18, %18 : vector<8x32xf32>
    %cst_18 = arith.constant dense<0.000000e+00> : vector<8xf32>
    %24 = vector.multi_reduction <add>, %23, %cst_18 [1] : vector<8x32xf32> to vector<8xf32>
    %25 = vector.shape_cast %24 : vector<8xf32> to vector<8x1xf32>
    %26 = arith.mulf %19, %19 : vector<8x32xf32>
    %cst_19 = arith.constant dense<0.000000e+00> : vector<8xf32>
    %27 = vector.multi_reduction <add>, %26, %cst_19 [1] : vector<8x32xf32> to vector<8xf32>
    %28 = vector.shape_cast %27 : vector<8xf32> to vector<8x1xf32>
    %29 = arith.mulf %16, %18 : vector<8x32xf32>
    %cst_20 = arith.constant dense<0.000000e+00> : vector<8xf32>
    %30 = vector.multi_reduction <add>, %29, %cst_20 [1] : vector<8x32xf32> to vector<8xf32>
    %31 = vector.shape_cast %30 : vector<8xf32> to vector<8x1xf32>
    %32 = arith.mulf %16, %19 : vector<8x32xf32>
    %cst_21 = arith.constant dense<0.000000e+00> : vector<8xf32>
    %33 = vector.multi_reduction <add>, %32, %cst_21 [1] : vector<8x32xf32> to vector<8xf32>
    %34 = vector.shape_cast %33 : vector<8xf32> to vector<8x1xf32>
    %35 = arith.mulf %22, %25 : vector<8x1xf32>
    %cst_22 = arith.constant 1.000000e-16 : f32
    %36 = vector.broadcast %cst_22 : f32 to vector<8x1xf32>
    %37 = arith.maximumf %35, %36 : vector<8x1xf32>
    %38 = math.rsqrt %37 : vector<8x1xf32>
    %39 = arith.mulf %31, %38 : vector<8x1xf32>
    %40 = arith.mulf %22, %28 : vector<8x1xf32>
    %cst_23 = arith.constant 1.000000e-16 : f32
    %41 = vector.broadcast %cst_23 : f32 to vector<8x1xf32>
    %42 = arith.maximumf %40, %41 : vector<8x1xf32>
    %43 = math.rsqrt %42 : vector<8x1xf32>
    %44 = arith.mulf %34, %43 : vector<8x1xf32>
    %45 = tpu.concatenate %39, %44 in 1 : vector<8x1xf32>, vector<8x1xf32> -> vector<8x2xf32>
    %c0_24 = arith.constant 0 : index
    %c0_25 = arith.constant 0 : index
    %46 = vector.load %arg9[%c0_24, %c0_25] : memref<8x2xf32, #tpu.memory_space<vmem>>, vector<8x2xf32>
    tpu.vector_store %arg9[%c0_24, %c0_25], %45 {strides = array<i32>} : memref<8x2xf32, #tpu.memory_space<vmem>>, vector<8x2xf32>,
    return
  }
  func.func @transform_0(%arg0: i32) -> (i32, i32) {
    %c0_i32 = arith.constant 0 : i32
    %c0_i32_0 = arith.constant 0 : i32
    return %arg0, %c0_i32 : i32, i32
  }
  func.func @transform_1(%arg0: i32) -> (i32, i32) {
    %c0_i32 = arith.constant 0 : i32
    %c0_i32_0 = arith.constant 0 : i32
    %c0_i32_1 = arith.constant 0 : i32
    return %c0_i32, %c0_i32_0 : i32, i32
  }
  func.func @transform_2(%arg0: i32) -> (i32, i32) {
    %c0_i32 = arith.constant 0 : i32
    %c0_i32_0 = arith.constant 0 : i32
    %c0_i32_1 = arith.constant 0 : i32
    return %c0_i32, %c0_i32_0 : i32, i32
  }
  func.func @transform_3(%arg0: i32) -> (i32, i32) {
    %c0_i32 = arith.constant 0 : i32
    %c0_i32_0 = arith.constant 0 : i32
    %c0_i32_1 = arith.constant 0 : i32
    return %c0_i32, %c0_i32_0 : i32, i32
  }
  func.func @transform_4(%arg0: i32) -> (i32, i32) {
    %c0_i32 = arith.constant 0 : i32
    %c0_i32_0 = arith.constant 0 : i32
    %c0_i32_1 = arith.constant 0 : i32
    return %c0_i32, %c0_i32_0 : i32, i32
  }
  func.func @transform_5(%arg0: i32) -> (i32, i32) {
    %c0_i32 = arith.constant 0 : i32
    %c0_i32_0 = arith.constant 0 : i32
    return %arg0, %c0_i32 : i32, i32
  }
  func.func @transform_6(%arg0: i32) -> (i32, i32) {
    %c0_i32 = arith.constant 0 : i32
    %c0_i32_0 = arith.constant 0 : i32
    return %arg0, %c0_i32 : i32, i32
  }
  func.func @transform_7(%arg0: i32) -> (i32, i32) {
    %c0_i32 = arith.constant 0 : i32
    %c0_i32_0 = arith.constant 0 : i32
    return %arg0, %c0_i32 : i32, i32
  }
  func.func @transform_8(%arg0: i32) -> (i32, i32) {
    %c0_i32 = arith.constant 0 : i32
    %c0_i32_0 = arith.constant 0 : i32
    return %arg0, %c0_i32 : i32, i32
  }
}

</mosaic_0001>

<bundles_post_ra>
// kernel: triplet_network_cos.1
= control target key start
LH: loop header
LB: loop body
LE: loop exit
PB: predicated region body
PF: predicated region fallthrough
CT: control target
= control target key end

     0   :  { %v270_v3 = vmov 0.0   ;;  %vm271_vm0 = vmmov 0   ;;  %s391_s0 = inlined_call_operand.vmem [shape: f32[8,32], index: 0, kind: input, shape index: {}]   ;;  %s392_s1 = inlined_call_operand.vmem [shape: f32[32,64], index: 1, kind: input, shape index: {}]   ;;  %s393_s2 = inlined_call_operand.vmem [shape: f32[1,64], index: 2, kind: input, shape index: {}]   ;;  %s394_s3 = inlined_call_operand.vmem [shape: f32[64,32], index: 3, kind: input, shape index: {}]   ;;  %s395_s4 = inlined_call_operand.vmem [shape: f32[1,32], index: 4, kind: input, shape index: {}]   ;;  %s396_s5 = inlined_call_operand.vmem [shape: f32[8,32], index: 5, kind: input, shape index: {}]   ;;  %s397_s6 = inlined_call_operand.vmem [shape: f32[8,32], index: 6, kind: input, shape index: {}]   ;;  %s398_s7 = inlined_call_operand.hbm [shape: f32[8,32], index: 7, kind: output, shape index: {0}]   ;;  %s399_s8 = inlined_call_operand.vmem [shape: f32[8,2], index: 8, kind: output, shape index: {1}]  }
   0x1   :  { %v32_v0 = vld [vmem:[%s392_s1] sm:$0xff]  ;;  %v33_v1 = vld [vmem:[%s392_s1 + $0x8] sm:$0xff]  ;;  %v34_v2 = vld [vmem:[%s392_s1 + $0x10] sm:$0xff]  ;;  %219 = vmatprep.subr.bf16.mxu0 %v270_v3  ;;  %223 = vmatprep.mubr.msk.bf16.mxu0 %vm271_vm0, %v270_v3 }
   0x2   :  { %v36_v4 = vpack.c.bf16 %v33_v1, %v32_v0  ;;  %v35_v5 = vld [vmem:[%s392_s1 + $0x18] sm:$0xff]  ;;  %v38_v6 = vld [vmem:[%s394_s3] sm:$0xff]  ;;  %227 = vmatprep.subr.bf16.mxu1 %v270_v3  ;;  %v39_v7 = vld [vmem:[%s394_s3 + $0x8] sm:$0xff]  ;;  %235 = vmatprep.mubr.msk.bf16.mxu1 %vm271_vm0, %v270_v3 }
   0x3   :  { %v40_v8 = vld [vmem:[%s394_s3 + $0x10] sm:$0xff]  ;;  %v41_v9 = vld [vmem:[%s394_s3 + $0x18] sm:$0xff]  ;;  %v37_v10 = vpack.c.bf16 %v35_v5, %v34_v2  ;;  %v30_v11 = vld [vmem:[%s391_s0] sm:$0xff]  ;;  %v46_v12 = vpack.c.bf16 %v39_v7, %v38_v6 }
   0x4   :  { %220 = vmatpush3.bf16.msra.mxu0 %v36_v4 }
   0x5   :  { %14 = vsyncpa [#allocation3], 0  ;;  %221 = vmatprep.subr.bf16.mxu0 %v270_v3  ;;  %228 = vmatpush3.bf16.msra.mxu1 %v46_v12  ;;  %v47_v13 = vpack.c.bf16 %v41_v9, %v40_v8  ;;  %v31_v14 = vpack.c.bf16 %v30_v11, %v30_v11  ;;  %vm57_vm1 = vcmask 261120   ;;  %v42_v15 = vld [vmem:[%s394_s3 + $0x20] sm:$0xff]  ;;  %v43_v16 = vld [vmem:[%s394_s3 + $0x28] sm:$0xff]  ;;  %vm110_vm2 = vcmask 523264  }
   0x6   :  { %229 = vmatprep.subr.bf16.mxu1 %v270_v3  ;;  %v48_v17 = vpack.c.bf16 %v43_v16, %v42_v15  ;;  %v44_v18 = vld [vmem:[%s394_s3 + $0x30] sm:$0xff]  ;;  %v45_v19 = vld [vmem:[%s394_s3 + $0x38] sm:$0xff]  ;;  %v207_v21 = vld [vmem:[%s393_s2] ss:$0 sm:$0xff] }
   0x7   :  { %v49_v20 = vpack.c.bf16 %v45_v19, %v44_v18  ;;  %v156_v29 = vld [vmem:[%s397_s6] sm:$0xff] }
   0x8   :  { %222 = vmatpush3.bf16.msra.mxu0 %v37_v10  ;;  %v165_v30 = vmul.f32 %v156_v29, %v156_v29  ;;  %v209_v32 = vld [vmem:[%s395_s4] ss:$0 sm:$0xff]  ;;  %s272_s4 = smov [#allocation2]  }
   0x9   :  { %230 = vmatpush3.bf16.msra.mxu1 %v47_v13  ;;  %v155_v34 = vld [vmem:[%s396_s5] sm:$0xff]  ;;  %s195_s5 = sshll.u32 %s272_s4, 4  ;;  %s196_s5 = int_to_ptr.vmem [resolvable:$true] %s195_s5 }
   0xa   :  { %231 = vmatprep.subr.bf16.mxu1 %v270_v3  ;;  %v166_v31 = vsel %vm57_vm1, %v165_v30, 0.0  ;;  %v161_v41 = vmul.f32 %v155_v34, %v155_v34  ;;  %s246_s6 = scalar_lea.vmem %s196_s5, 128  ;;  %p251_p1 = scmp.lt.s32.totalorder %s196_s5, %s196_s5 }
   0xb   :  { %224 = vmatmul.mubr.msk.bf16.vlgmr.msra.gmra.mrb[0].mxu0 %vm57_vm1, %v31_v14  ;;  %167 = vadd.xlane.f32.xlu1 %v166_v31  ;;  %p247_p0 = scmp.ne.s32.totalorder %s196_s5, %s246_s6  ;;  %p252_p2 = scmp.lt.s32.totalorder %s246_s6, %s246_s6 }
   0xc   :  { %v162_v44 = vsel %vm57_vm1, %v161_v41, 0.0 }
   0xd   :  { %232 = vmatpush3.bf16.msra.mxu1 %v48_v17  ;;  %p253_p3 = por %p252_p2, %p251_p1 }
   0xe   :  { %233 = vmatprep.subr.bf16.mxu1 %v270_v3 }
   0xf   :  { %p254_p4 = pnand %p253_p3, %p247_p0 }
  0x11   :  { %234 = vmatpush3.bf16.msra.mxu1 %v49_v20 }
  0xde   :  { %v95_v22 = vpop.f32.mrb[0].mxu0 }
  0xdf   :  { %v96_v23 = vadd.f32 %v207_v21, %v95_v22  ;;  %v225_v24 = vpop.f32.mrb[1].mxu0 }
  0xe0   :  { %v98_v25 = vpop.f32.mrb[2].mxu0 }
  0xe1   :  { %v101_v26 = vmax.f32 %v96_v23, 0.0  ;;  %v226_v27 = vpop.f32.mrb[3].mxu0 }
  0xe3   :  { %v102_v28 = vpack.c.bf16 %v101_v26, %v101_v26 }
  0xe5   :  { %236 = vmatmul.mubr.msk.bf16.vlgmr.msra.gmra.mrb[0].mxu1 %vm110_vm2, %v102_v28 }
 0x1b8   :  { %v148_v33 = vpop.f32.mrb[0].mxu1 }
 0x1b9   :  { %v149_v35 = vadd.f32 %v209_v32, %v148_v33  ;;  %v237_v36 = vpop.f32.mrb[1].mxu1 }
 0x1ba   :  { %v151_v37 = vpop.f32.mrb[2].mxu1 }
 0x1bb   :  { %154 = vst.msk [vmem:[#allocation2] sm:$0xff] %vm57_vm1, %v149_v35  ;;  %v238_v38 = vpop.f32.mrb[3].mxu1  ;;  %v169_v39 = vmul.f32 %v155_v34, %v149_v35  ;;  %v157_v40 = vmul.f32 %v149_v35, %v149_v35  ;;  %v173_v45 = vmul.f32 %v156_v29, %v149_v35 }
 0x1bd   :  { %v170_v42 = vsel %vm57_vm1, %v169_v39, 0.0  ;;  %v158_v43 = vsel %vm57_vm1, %v157_v40, 0.0  ;;  %v174_v46 = vsel %vm57_vm1, %v173_v45, 0.0 }
 0x1be   :  { %171 = vadd.xlane.f32.xlu1 %v170_v42  ;;  %159 = vadd.xlane.f32.xlu0 %v158_v43 }
 0x1c2   :  { %163 = vadd.xlane.f32.xlu0 %v162_v44 }
 0x1c6   :  { %175 = vadd.xlane.f32.xlu0 %v174_v46 }
 0x1c7   :  { %257 = shalt.err (!%p254_p4)
}
 0x1c8   :  { %s258_s15 = scalar_lea.hbm %s398_s7, 128 }
 0x1c9   :  { %p259_p5 = scmp.ne.s32.totalorder %s398_s7, %s258_s15  ;;  %p262_p6 = scmp.lt.u32.totalorder %s258_s15, %s398_s7 }
 0x1cb   :  { %p264_p7 = pnand %p262_p6, %p259_p5 }
 0x1cd   :  { %267 = shalt.err (!%p264_p7)
}
 0x1ce   :  { %198 = dma.vmem_to_hbm [thread:$0]  %s196_s5, 128, %s398_s7, [#allocation3]   ;;  %v168_v47 = vpop.xlane.xlu1 %167  ;;  %vm185_vm3 = vcmask 7168   ;;  %vm187_vm4 = vcmask 15360  }
 0x24b   :  { %v160_v48 = vpop.xlane.xlu0 %159  ;;  %v172_v56 = vpop.xlane.xlu1 %171 }
 0x24c   :  { %v181_v49 = vmul.f32 %v168_v47, %v160_v48 }
 0x24e   :  { %v182_v50 = vmax.f32 %v181_v49, 1e-16 }
 0x24f   :  { %v164_v51 = vpop.xlane.xlu0 %163 }
 0x250   :  { %v177_v52 = vmul.f32 %v164_v51, %v160_v48  ;;  %242 = vrsqrt.f32 %v182_v50 }
 0x252   :  { %v178_v53 = vmax.f32 %v177_v52, 1e-16 }
 0x253   :  { %v176_v57 = vpop.xlane.xlu0 %175 }
 0x254   :  { %244 = vrsqrt.f32 %v178_v53 }
 0x25a   :  { %v243_v54 = vpop.eup %242 }
 0x25b   :  { %v184_v59 = vmul.f32 %v243_v54, %v176_v57 }
 0x25e   :  { %v245_v55 = vpop.eup %244 }
 0x25f   :  { %v180_v58 = vmul.f32 %v245_v55, %v172_v56 }
 0x261   :  { %v186_v60 = vsel %vm185_vm3, %v180_v58, %v184_v59 }
 0x262   :  { %188 = vst.msk [vmem:[%s399_s8] sm:$0xff] %vm187_vm4, %v186_v60 }
 0x263   :  { %268 = dma.done.wait [#allocation3], 128  }
 0x264   :  { %269 = vsyncadd [#allocation3], 4294967168 }
 0x265   :  { %206 = vsyncpa [#allocation3], 1 }

</bundles_post_ra>
